<compile_context>
chip_gen: v7x
topology: tpu7x:2x2x1
jax: 0.10.0
libtpu: 0.0.40
codegen_flags: <defaults>
</compile_context>

<pallas_src>
import functools

import jax
import jax.numpy as jnp
from jax.experimental import pallas as pl
from jax.experimental.pallas import tpu as pltpu

_LANES = 128
_ACC_ROWS = 64  # (64, 128) f32 accumulator = 8 vregs -> 8 independent add chains


def _round_up(x, m):
    return ((x + m - 1) // m) * m


def _tpu_defaults():
    """Generation-aware (num_shards, tile_rows) defaults.

    v7x: 2 TensorCores + ~3.2 TB/s HBM -> shard the row range 2-way and use
         8192-row (4 MiB) blocks (2 in x 2 bufs x 4 MiB = 16 MiB VMEM, fits the
         32 MiB scoped default thanks to the small accumulator).
    v5e/v6e: single TensorCore -> 1 shard (the parallel axis would just be a
         serial loop + an extra accumulator reset/reduce), 4096-row blocks
         (~94% of roofline already; 8192 would hit v5e's 16 MiB scoped VMEM).
    """
    try:
        kind = jax.devices()[0].device_kind.lower()
    except Exception:
        kind = ""
    if "v7" in kind or "7x" in kind:
        return 2, 8192
    return 1, 4096


def _mrae_kernel(out_ref, lbl_ref, part_ref, acc_ref, *,
                 valid_rows, tile_rows, needs_mask):
    # grid = (num_shards, steps); axis 0 "parallel" (megacore on v7x, size-1 or
    # serial elsewhere), axis 1 is the sequential reduction axis ("arbitrary").
    c = pl.program_id(0)
    i = pl.program_id(1)
    n = pl.num_programs(1)

    @pl.when(i == 0)
    def _():
        acc_ref[...] = jnp.zeros_like(acc_ref)

    # Cast in-kernel so bf16 callers keep bf16 in HBM (no wrapper upcast copy);
    # a no-op for f32 inputs.
    o = out_ref[...].astype(jnp.float32)
    l = lbl_ref[...].astype(jnp.float32)

    if needs_mask:
        # Logical (unclamped) global row of each element of this block.  Rows
        # >= valid_rows are out-of-bounds garbage: force label to 1.0 BEFORE
        # the reciprocal and zero the error AFTER, so Inf/NaN never reaches
        # the accumulator.
        block_start = (c * n + i) * tile_rows
        row = jax.lax.broadcasted_iota(jnp.int32, (tile_rows, _LANES), 0)
        mask = (row + block_start) < valid_rows
        l = jnp.where(mask, l, 1.0)
        err = jnp.abs(o - l) * pl.reciprocal(l, approx=False)
        err = jnp.where(mask, err, 0.0)
    else:
        # Exact fit: no mask work at all (keeps VALU free on bf16 inputs).
        err = jnp.abs(o - l) * pl.reciprocal(l, approx=False)

    # Sublane-group reduction into the small accumulator: reshape splits the
    # sublane axis only (minor (8,128) tiles untouched -> free), and the
    # axis-0 sum is a tree of VALU vreg adds (no XLU).
    acc_ref[...] += jnp.sum(
        err.reshape(tile_rows // _ACC_ROWS, _ACC_ROWS, _LANES), axis=0)

    @pl.when(i == n - 1)
    def _():
        # Single small cross-lane/XLU reduce per shard (64*128 elements);
        # broadcast the partial sum into this shard's (8,128)-legal block.
        s = jnp.sum(acc_ref[...])
        part_ref[...] = jnp.zeros(part_ref.shape, jnp.float32) + s


def mrae_loss(outputs, label, *, tile_rows=None, num_shards=None):
    assert outputs.shape == label.shape
    # TODO(synk): the PyTorch module prints 'here' if any label == 0; a host
    # print is a Python side effect with no Pallas equivalent (value unaffected).
    default_shards, default_tile = _tpu_defaults()
    if num_shards is None:
        num_shards = default_shards
    if tile_rows is None:
        tile_rows = default_tile
    tile_rows = max(_ACC_ROWS, _round_up(tile_rows, _ACC_ROWS))

    total = outputs.size
    # Only a <128-element lane remainder still pads (value 1.0 -> |1-1|/1 == 0).
    # The common total % 128 == 0 case is a pure metadata reshape: no copy.
    lane_pad = (-total) % _LANES

    def _prep(x):
        flat = x.reshape(-1)
        if lane_pad:
            flat = jnp.pad(flat, (0, lane_pad), constant_values=1)
        return flat.reshape(-1, _LANES)

    o2 = _prep(outputs)
    l2 = _prep(label)
    rows = o2.shape[0]

    def _tiling(shards):
        tr = min(tile_rows, _round_up(pl.cdiv(rows, shards), _ACC_ROWS))
        return tr, pl.cdiv(rows, shards * tr)

    tr, steps = _tiling(num_shards)
    # Never leave a shard with zero valid rows (tiny inputs): collapse to 1.
    if num_shards > 1 and (num_shards - 1) * steps * tr >= rows:
        num_shards = 1
        tr, steps = _tiling(num_shards)

    needs_mask = num_shards * steps * tr != rows
    # Blocks past the last data-containing block (only possible with >1 shard
    # on ragged row counts) are clamped to the last valid block so the
    # auto-pipeline DMA stays in bounds; they are fully masked in-kernel.
    last_block = pl.cdiv(rows, tr) - 1

    def in_map(c, i):
        return (jnp.minimum(c * steps + i, last_block), 0)

    kernel = functools.partial(
        _mrae_kernel,
        valid_rows=rows,
        tile_rows=tr,
        needs_mask=needs_mask,
    )

    # 2 inputs x 2 pipeline buffers + accumulator/output/headroom.
    in_block_bytes = tr * _LANES * o2.dtype.itemsize
    vmem_limit = int(4 * in_block_bytes + (4 << 20))

    parts = pl.pallas_call(
        kernel,
        out_shape=jax.ShapeDtypeStruct((num_shards, 8, _LANES), jnp.float32),
        grid_spec=pltpu.PrefetchScalarGridSpec(
            num_scalar_prefetch=0,
            grid=(num_shards, steps),
            in_specs=[
                pl.BlockSpec((tr, _LANES), in_map),
                pl.BlockSpec((tr, _LANES), in_map),
            ],
            out_specs=pl.BlockSpec((1, 8, _LANES), lambda c, i: (c, 0, 0)),
            scratch_shapes=[pltpu.VMEM((_ACC_ROWS, _LANES), jnp.float32)],
        ),
        compiler_params=pltpu.CompilerParams(
            # TODO(synk): on v7x, confirm in xprof that the leading axis is
            # split across the two TensorCores; if not, switch it to
            # pltpu.CORE_PARALLEL.  Harmless (size 1 or serial) elsewhere.
            dimension_semantics=("parallel", "arbitrary"),
            vmem_limit_bytes=vmem_limit,
        ),
    )(o2, l2)

    # Each shard's output block holds its partial sum (broadcast); divide by
    # the TRUE element count so padding/masked rows never enter the mean.
    return jnp.sum(parts[:, 0, 0]) / jnp.float32(total)


if __name__ == "__main__":
    key = jax.random.PRNGKey(0)
    k1, k2, k3, k4, k5, k6 = jax.random.split(key, 6)

    # NCHW inputs, e.g. hyperspectral recovery: batch=2, channels=4, 16x16.
    shape = (2, 4, 16, 16)
    outputs = jax.random.uniform(k1, shape, jnp.float32, minval=0.1, maxval=1.0)
    label = jax.random.uniform(k2, shape, jnp.float32, minval=0.1, maxval=1.0)
    mrae = jax.block_until_ready(mrae_loss(outputs, label))
    ref = jnp.mean(jnp.abs(outputs - label) / label)
    assert jnp.allclose(mrae, ref, rtol=1e-5, atol=1e-6), (mrae, ref)

    # Ragged total (not a multiple of 128) -> exercises the lane-remainder pad
    # plus the in-kernel partial-block mask.
    shape2 = (3, 5, 7, 11)
    outputs2 = jax.random.uniform(k3, shape2, jnp.float32, minval=0.1, maxval=1.0)
    label2 = jax.random.uniform(k4, shape2, jnp.float32, minval=0.1, maxval=1.0)
    mrae2 = jax.block_until_ready(mrae_loss(outputs2, label2))
    ref2 = jnp.mean(jnp.abs(outputs2 - label2) / label2)
    assert jnp.allclose(mrae2, ref2, rtol=1e-5, atol=1e-6), (mrae2, ref2)

    # Small 31-band tensor with a forced tiny tile + 2 shards: exercises the
    # multi-block accumulation path, the shard axis, and the ragged-row mask.
    shape3 = (2, 31, 16, 16)
    outputs3 = jax.random.uniform(k5, shape3, jnp.float32, minval=0.1, maxval=1.0)
    label3 = jax.random.uniform(k6, shape3, jnp.float32, minval=0.1, maxval=1.0)
    mrae3 = jax.block_until_ready(
        mrae_loss(outputs3, label3, tile_rows=64, num_shards=2))
    ref3 = jnp.mean(jnp.abs(outputs3 - label3) / label3)
    assert jnp.allclose(mrae3, ref3, rtol=1e-5, atol=1e-6), (mrae3, ref3)

    print("KERNEL_OK")
</pallas_src>

<mosaic_0001>
module attributes {stable_mosaic.version = 11 : i64} {
  func.func @_mrae_kernel(%arg0: i32, %arg1: i32, %arg2: memref<64x128xf32, #tpu.memory_space<vmem>>, %arg3: memref<64x128xf32, #tpu.memory_space<vmem>>, %arg4: memref<1x8x128xf32, #tpu.memory_space<vmem>>, %arg5: memref<64x128xf32, #tpu.memory_space<vmem>>) attributes {dimension_semantics = [#tpu.dimension_semantics<parallel>, #tpu.dimension_semantics<arbitrary>], iteration_bounds = array<i64: 1, 1>, scalar_prefetch = 0 : i64, scratch_operands = 1 : i64, tpu.core_type = #tpu.core_type<tc>, window_params = [{transform_indices = @transform_0, window_bounds = array<i64: 64, 128>}, {transform_indices = @transform_1, window_bounds = array<i64: 64, 128>}, {transform_indices = @transform_2, window_bounds = array<i64: 1, 8, 128>}]} {
    %c0_i32 = arith.constant 0 : i32
    %0 = arith.cmpi eq, %arg1, %c0_i32 : i32
    %1 = arith.extui %0 : i1 to i32
    %c0_i32_0 = arith.constant 0 : i32
    %2 = arith.cmpi ne, %1, %c0_i32_0 : i32
    scf.if %2 {
      %cst_12 = arith.constant 0.000000e+00 : f32
      %29 = vector.broadcast %cst_12 : f32 to vector<64x128xf32>
      %c0_13 = arith.constant 0 : index
      %c0_14 = arith.constant 0 : index
      %30 = vector.load %arg5[%c0_13, %c0_14] : memref<64x128xf32, #tpu.memory_space<vmem>>, vector<64x128xf32>
      tpu.vector_store %arg5[%c0_13, %c0_14], %29 {strides = array<i32>} : memref<64x128xf32, #tpu.memory_space<vmem>>, vector<64x128xf32>,
    } else {
    }
    %c0 = arith.constant 0 : index
    %c0_1 = arith.constant 0 : index
    %3 = vector.load %arg2[%c0, %c0_1] : memref<64x128xf32, #tpu.memory_space<vmem>>, vector<64x128xf32>
    %c0_2 = arith.constant 0 : index
    %c0_3 = arith.constant 0 : index
    %4 = vector.load %arg3[%c0_2, %c0_3] : memref<64x128xf32, #tpu.memory_space<vmem>>, vector<64x128xf32>
    %c1_i32 = arith.constant 1 : i32
    %5 = arith.muli %arg0, %c1_i32 : i32
    %6 = arith.addi %5, %arg1 : i32
    %c64_i32 = arith.constant 64 : i32
    %7 = arith.muli %6, %c64_i32 : i32
    %8 = tpu.iota {dimensions = array<i32: 0>} : vector<64x128xi32>
    %9 = vector.broadcast %7 : i32 to vector<64x128xi32>
    %10 = arith.addi %8, %9 : vector<64x128xi32>
    %c16_i32 = arith.constant 16 : i32
    %11 = vector.broadcast %c16_i32 : i32 to vector<64x128xi32>
    %12 = arith.cmpi slt, %10, %11 : vector<64x128xi32>
    %cst = arith.constant 1.000000e+00 : f32
    %13 = vector.broadcast %cst : f32 to vector<64x128xf32>
    %14 = arith.select %12, %4, %13 : vector<64x128xi1>, vector<64x128xf32>
    %15 = arith.subf %3, %14 : vector<64x128xf32>
    %16 = math.absf %15 : vector<64x128xf32>
    %17 = tpu.reciprocal %14 : vector<64x128xf32> -> vector<64x128xf32>
    %18 = arith.mulf %16, %17 : vector<64x128xf32>
    %cst_4 = arith.constant 0.000000e+00 : f32
    %19 = vector.broadcast %cst_4 : f32 to vector<64x128xf32>
    %20 = arith.select %12, %18, %19 : vector<64x128xi1>, vector<64x128xf32>
    %c0_5 = arith.constant 0 : index
    %c0_6 = arith.constant 0 : index
    %21 = vector.load %arg5[%c0_5, %c0_6] : memref<64x128xf32, #tpu.memory_space<vmem>>, vector<64x128xf32>
    %22 = vector.shape_cast %20 : vector<64x128xf32> to vector<1x64x128xf32>
    %cst_7 = arith.constant dense<0.000000e+00> : vector<64x128xf32>
    %23 = vector.multi_reduction <add>, %22, %cst_7 [0] : vector<1x64x128xf32> to vector<64x128xf32>
    %24 = arith.addf %21, %23 : vector<64x128xf32>
    %c0_8 = arith.constant 0 : index
    %c0_9 = arith.constant 0 : index
    %25 = vector.load %arg5[%c0_8, %c0_9] : memref<64x128xf32, #tpu.memory_space<vmem>>, vector<64x128xf32>
    tpu.vector_store %arg5[%c0_8, %c0_9], %24 {strides = array<i32>} : memref<64x128xf32, #tpu.memory_space<vmem>>, vector<64x128xf32>,
    %c0_i32_10 = arith.constant 0 : i32
    %26 = arith.cmpi eq, %arg1, %c0_i32_10 : i32
    %27 = arith.extui %26 : i1 to i32
    %c0_i32_11 = arith.constant 0 : i32
    %28 = arith.cmpi ne, %27, %c0_i32_11 : i32
    scf.if %28 {
      %c0_12 = arith.constant 0 : index
      %c0_13 = arith.constant 0 : index
      %29 = vector.load %arg5[%c0_12, %c0_13] : memref<64x128xf32, #tpu.memory_space<vmem>>, vector<64x128xf32>
      %30 = vector.shape_cast %29 : vector<64x128xf32> to vector<1x64x128xf32>
      %cst_14 = arith.constant dense<0.000000e+00> : vector<1xf32>
      %31 = vector.multi_reduction <add>, %30, %cst_14 [1, 2] : vector<1x64x128xf32> to vector<1xf32>
      %32 = vector.shape_cast %31 : vector<1xf32> to vector<1x1x1xf32>
      %33 = vector.extract %32[0, 0, 0] : f32 from vector<1x1x1xf32>
      %cst_15 = arith.constant 0.000000e+00 : f32
      %34 = vector.broadcast %cst_15 : f32 to vector<1x8x128xf32>
      %35 = vector.broadcast %33 : f32 to vector<1x8x128xf32>
      %36 = arith.addf %34, %35 : vector<1x8x128xf32>
      %c0_16 = arith.constant 0 : index
      %c0_17 = arith.constant 0 : index
      %c0_18 = arith.constant 0 : index
      %37 = vector.load %arg4[%c0_16, %c0_17, %c0_18] : memref<1x8x128xf32, #tpu.memory_space<vmem>>, vector<1x8x128xf32>
      tpu.vector_store %arg4[%c0_16, %c0_17, %c0_18], %36 {strides = array<i32>} : memref<1x8x128xf32, #tpu.memory_space<vmem>>, vector<1x8x128xf32>,
    } else {
    }
    return
  }
  func.func @transform_0(%arg0: i32, %arg1: i32) -> (i32, i32) {
    %c1_i32 = arith.constant 1 : i32
    %0 = arith.muli %arg0, %c1_i32 : i32
    %1 = arith.addi %0, %arg1 : i32
    %c0_i32 = arith.constant 0 : i32
    %2 = arith.minsi %1, %c0_i32 : i32
    %c0_i32_0 = arith.constant 0 : i32
    %c0_i32_1 = arith.constant 0 : i32
    return %2, %c0_i32_0 : i32, i32
  }
  func.func @transform_1(%arg0: i32, %arg1: i32) -> (i32, i32) {
    %c1_i32 = arith.constant 1 : i32
    %0 = arith.muli %arg0, %c1_i32 : i32
    %1 = arith.addi %0, %arg1 : i32
    %c0_i32 = arith.constant 0 : i32
    %2 = arith.minsi %1, %c0_i32 : i32
    %c0_i32_0 = arith.constant 0 : i32
    %c0_i32_1 = arith.constant 0 : i32
    return %2, %c0_i32_0 : i32, i32
  }
  func.func @transform_2(%arg0: i32, %arg1: i32) -> (i32, i32, i32) {
    %c0_i32 = arith.constant 0 : i32
    %c0_i32_0 = arith.constant 0 : i32
    %c0_i32_1 = arith.constant 0 : i32
    return %arg0, %c0_i32, %c0_i32_0 : i32, i32, i32
  }
}

</mosaic_0001>

<bundles_post_ra>
// kernel: tpu_custom_call.1
= control target key start
LH: loop header
LB: loop body
LE: loop exit
PB: predicated region body
PF: predicated region fallthrough
CT: control target
= control target key end

     0   :  { %7 = vsyncpa [#allocation4], 0  ;;  %s403_s0 = inlined_call_operand.hbm [shape: f32[16,128], index: 0, kind: input, shape index: {}]   ;;  %s404_s1 = inlined_call_operand.hbm [shape: f32[16,128], index: 1, kind: input, shape index: {}]   ;;  %s405_s2 = inlined_call_operand.hbm [shape: f32[1,8,128], index: 2, kind: output, shape index: {}]  }
   0x1   :  { %8 = vsyncpa [#allocation7], 0 }
   0x2   :  { %9 = vsyncpa [#allocation5], 0 }
   0x3   :  { %20 = vsyncadd [#allocation4], 768  ;;  %s347_s9 = smov [#allocation3]   ;;  %s275_s13 = scalar_lea.hbm %s403_s0, 256 }
   0x4   :  { %s25_s10 = sshll.u32 %s347_s9, 4  ;;  %p276_p0 = scmp.ne.s32.totalorder %s403_s0, %s275_s13  ;;  %s26_s10 = int_to_ptr.vmem [resolvable:$true] %s25_s10 }
   0x5   :  { %p279_p1 = scmp.lt.u32.totalorder %s275_s13, %s403_s0 }
   0x7   :  { %p281_p2 = pnand %p279_p1, %p276_p0 }
   0x9   :  { %284 = shalt.err (!%p281_p2)
}
   0xa   :  { %s285_s18 = scalar_lea.vmem %s26_s10, 256  ;;  %s289_s19 = scalar_lea.vmem %s26_s10, 1024 }
   0xb   :  { %p286_p3 = scmp.ne.s32.totalorder %s26_s10, %s285_s18  ;;  %p290_p4 = scmp.lt.s32.totalorder %s26_s10, %s26_s10 }
   0xc   :  { %p291_p5 = scmp.lt.s32.totalorder %s289_s19, %s285_s18 }
   0xe   :  { %p292_p6 = por %p291_p5, %p290_p4 }
  0x10   :  { %p293_p7 = pnand %p292_p6, %p286_p3 }
  0x12   :  { %296 = shalt.err (!%p293_p7)
}
  0x13   :  { %s348_s20 = smov 128   ;;  %s349_s21 = smov 8  }
  0x14   :  { %31 = dma.hbm_to_vmem [thread:$0]  %s403_s0, 256, %s26_s10, [#allocation4], %s348_s20, %s348_s20, %s349_s21  }
  0x15   :  { %42 = vsyncadd [#allocation7], 768  ;;  %s350_s24 = smov [#allocation6]   ;;  %s297_s28 = scalar_lea.hbm %s404_s1, 256 }
  0x16   :  { %s47_s25 = sshll.u32 %s350_s24, 4  ;;  %p298_p8 = scmp.ne.s32.totalorder %s404_s1, %s297_s28  ;;  %s48_s25 = int_to_ptr.vmem [resolvable:$true] %s47_s25 }
  0x17   :  { %p301_p9 = scmp.lt.u32.totalorder %s297_s28, %s404_s1 }
  0x19   :  { %p303_p10 = pnand %p301_p9, %p298_p8 }
  0x1b   :  { %306 = shalt.err (!%p303_p10)
}
  0x1c   :  { %s307_s5 = scalar_lea.vmem %s48_s25, 256  ;;  %s311_s0 = scalar_lea.vmem %s48_s25, 1024 }
  0x1d   :  { %p308_p11 = scmp.ne.s32.totalorder %s48_s25, %s307_s5  ;;  %p312_p12 = scmp.lt.s32.totalorder %s48_s25, %s48_s25 }
  0x1e   :  { %p313_p13 = scmp.lt.s32.totalorder %s311_s0, %s307_s5 }
  0x20   :  { %p314_p0 = por %p313_p13, %p312_p12 }
  0x22   :  { %p315_p1 = pnand %p314_p0, %p308_p11 }
  0x24   :  { %318 = shalt.err (!%p315_p1)
}
  0x25   :  { %53 = dma.hbm_to_vmem [thread:$0]  %s404_s1, 256, %s48_s25, [#allocation7], %s348_s20, %s348_s20, %s349_s21  }
  0x26   :  { %341 = dma.done.wait [#allocation4], 1024  }
  0x27   :  { %342 = vsyncadd [#allocation4], 4294966272 }
  0x28   :  { %343 = dma.done.wait [#allocation7], 1024  }
  0x29   :  { %344 = vsyncadd [#allocation7], 4294966272  ;;  %v92_v0 = vld [vmem:[#allocation6] sm:$0xff]  ;;  %v93_v2 = vld [vmem:[#allocation6 + $0x8] sm:$0xff]  ;;  %s351_s1 = smov [#allocation8]  }
  0x2a   :  { %v84_v1 = vld [vmem:[#allocation3] sm:$0xff]  ;;  %271 = vrcp.f32 %v92_v0  ;;  %v85_v3 = vld [vmem:[#allocation3 + $0x8] sm:$0xff]  ;;  %s244_s8 = sshll.u32 %s351_s1, 4  ;;  %s245_s8 = int_to_ptr.vmem [resolvable:$true] %s244_s8 }
  0x2b   :  { %273 = vrcp.f32 %v93_v2  ;;  %v136_v4 = vsub.f32 %v84_v1, %v92_v0  ;;  %v137_v5 = vsub.f32 %v85_v3, %v93_v2  ;;  %s319_s10 = scalar_lea.vmem %s245_s8, 128  ;;  %p324_p3 = scmp.lt.s32.totalorder %s245_s8, %s245_s8 }
  0x2c   :  { %p320_p2 = scmp.ne.s32.totalorder %s245_s8, %s319_s10  ;;  %p325_p4 = scmp.lt.s32.totalorder %s319_s10, %s319_s10 }
  0x2d   :  { %v144_v6 = vand.u32 2147483647, %v136_v4  ;;  %v145_v7 = vand.u32 2147483647, %v137_v5 }
  0x2e   :  { %p326_p5 = por %p325_p4, %p324_p3 }
  0x30   :  { %p327_p6 = pnand %p326_p5, %p320_p2 }
  0x34   :  { %v272_v8 = vpop.eup %271 }
  0x35   :  { %v274_v9 = vpop.eup %273  ;;  %v160_v10 = vmul.f32 %v272_v8, %v144_v6 }
  0x36   :  { %v161_v11 = vmul.f32 %v274_v9, %v145_v7 }
  0x38   :  { %v219_v12 = vadd.f32 %v161_v11, %v160_v10 }
  0x3a   :  { %226 = vadd.xlane.f32.xlu0 %v219_v12 }
  0xc7   :  { %v227_v13 = vpop.xlane.xlu0 %226 }
  0xc8   :  { %v228_v14 = vrot.slane %v227_v13, 4 }
  0xca   :  { %v229_v15 = vadd.f32 %v228_v14, %v227_v13 }
  0xcc   :  { %v230_v16 = vrot.slane %v229_v15, 2 }
  0xce   :  { %v231_v17 = vadd.f32 %v230_v16, %v229_v15 }
  0xd0   :  { %v232_v18 = vrot.slane %v231_v17, 1 }
  0xd2   :  { %v233_v19 = vadd.f32 %v232_v18, %v231_v17 }
  0xd4   :  { %264 = vpush %v233_v19 }
 0x105   :  { %s265_s9 = spop %264 }
 0x106   :  { %v235_v20 = vstv %s265_s9 }
 0x107   :  { %237 = vst [vmem:[#allocation8] sm:$0xff] %v235_v20 }
 0x108   :  { %330 = shalt.err (!%p327_p6)
}
 0x109   :  { %s331_s13 = scalar_lea.hbm %s405_s2, 128 }
 0x10a   :  { %p332_p7 = scmp.ne.s32.totalorder %s405_s2, %s331_s13  ;;  %p335_p8 = scmp.lt.u32.totalorder %s331_s13, %s405_s2 }
 0x10c   :  { %p337_p9 = pnand %p335_p8, %p332_p7 }
 0x10e   :  { %340 = shalt.err (!%p337_p9)
}
 0x10f   :  { %247 = dma.vmem_to_hbm [thread:$0]  %s245_s8, 128, %s405_s2, [#allocation5]  }
 0x110   :  { %345 = dma.done.wait [#allocation5], 128  }
 0x111   :  { %346 = vsyncadd [#allocation5], 4294967168 }
 0x112   :  { %251 = vsyncpa [#allocation4], 1 }
 0x113   :  { %252 = vsyncpa [#allocation7], 1 }
 0x114   :  { %253 = vsyncpa [#allocation5], 1 }

</bundles_post_ra>
